<compile_context>
chip_gen: v6e
topology: v6e:2x2x1
jax: 0.10.0
libtpu: 0.0.40
codegen_flags: <defaults>
</compile_context>

<pallas_src>
import functools

import jax
import jax.numpy as jnp
from jax.experimental import pallas as pl
from jax.experimental.pallas import tpu as pltpu

_VMEM_LIMIT = 32 * 1024 * 1024  # explicit scoped-VMEM budget (safe on v5e/v6e/v7x)


def _pick_tile(n, pref):
    """Largest power-of-two tile <= pref dividing n; falls back to the full dim."""
    t = pref
    while t >= 8:
        if n % t == 0:
            return t
        t //= 2
    return n


# ---------------------------------------------------------------------------
# LayerNorm kernel
# ---------------------------------------------------------------------------
def _layernorm_kernel(x_ref, g_ref, b_ref, o_ref):
    x = x_ref[...].astype(jnp.float32)                    # (tm, D)
    mean = jnp.mean(x, axis=-1, keepdims=True)
    xc = x - mean
    var = jnp.mean(xc * xc, axis=-1, keepdims=True)
    y = xc * jax.lax.rsqrt(var + 1e-5)
    y = y * g_ref[...].astype(jnp.float32) + b_ref[...].astype(jnp.float32)
    o_ref[...] = y.astype(o_ref.dtype)


def layernorm(x2d, gamma, beta):
    M, D = x2d.shape
    tm = _pick_tile(M, 256)
    g = gamma.reshape(1, D)
    b = beta.reshape(1, D)
    return pl.pallas_call(
        _layernorm_kernel,
        out_shape=jax.ShapeDtypeStruct((M, D), x2d.dtype),
        grid_spec=pltpu.PrefetchScalarGridSpec(
            num_scalar_prefetch=0,
            grid=(M // tm,),
            in_specs=[
                pl.BlockSpec((tm, D), lambda i: (i, 0)),
                pl.BlockSpec((1, D), lambda i: (0, 0)),
                pl.BlockSpec((1, D), lambda i: (0, 0)),
            ],
            out_specs=pl.BlockSpec((tm, D), lambda i: (i, 0)),
        ),
        compiler_params=pltpu.CompilerParams(
            dimension_semantics=("parallel",),
            vmem_limit_bytes=_VMEM_LIMIT,
        ),
    )(x2d, g, b)


# ---------------------------------------------------------------------------
# Tiled matmul with fused bias / GELU / residual epilogue
# ---------------------------------------------------------------------------
def _make_matmul_kernel(has_bias, has_residual, activation):
    def kernel(*refs):
        a_ref, b_ref = refs[0], refs[1]
        i = 2
        bias_ref = res_ref = None
        if has_bias:
            bias_ref = refs[i]
            i += 1
        if has_residual:
            res_ref = refs[i]
            i += 1
        o_ref = refs[i]
        acc_ref = refs[i + 1]

        @pl.when(pl.program_id(2) == 0)
        def _():
            acc_ref[...] = jnp.zeros(acc_ref.shape, jnp.float32)

        acc_ref[...] += jnp.dot(a_ref[...], b_ref[...],
                                preferred_element_type=jnp.float32)

        @pl.when(pl.program_id(2) == pl.num_programs(2) - 1)
        def _():
            out = acc_ref[...]
            if has_bias:
                out = out + bias_ref[...].astype(jnp.float32)
            if activation == "gelu":
                out = jax.nn.gelu(out, approximate=True)
            if has_residual:
                out = out + res_ref[...].astype(jnp.float32)
            o_ref[...] = out.astype(o_ref.dtype)

    return kernel


def linear(a, w, bias=None, residual=None, activation=None,
           tm_pref=256, tn_pref=256, tk_pref=512):
    M, K = a.shape
    K2, N = w.shape
    assert K == K2
    tm = _pick_tile(M, tm_pref)
    tn = _pick_tile(N, tn_pref)
    tk = _pick_tile(K, tk_pref)

    in_specs = [
        pl.BlockSpec((tm, tk), lambda i, j, k: (i, k)),
        pl.BlockSpec((tk, tn), lambda i, j, k: (k, j)),
    ]
    args = [a, w]
    if bias is not None:
        in_specs.append(pl.BlockSpec((1, tn), lambda i, j, k: (0, j)))
        args.append(bias.reshape(1, N))
    if residual is not None:
        in_specs.append(pl.BlockSpec((tm, tn), lambda i, j, k: (i, j)))
        args.append(residual)

    kernel = _make_matmul_kernel(bias is not None, residual is not None, activation)
    return pl.pallas_call(
        kernel,
        out_shape=jax.ShapeDtypeStruct((M, N), a.dtype),
        grid_spec=pltpu.PrefetchScalarGridSpec(
            num_scalar_prefetch=0,
            grid=(M // tm, N // tn, K // tk),
            in_specs=in_specs,
            out_specs=pl.BlockSpec((tm, tn), lambda i, j, k: (i, j)),
            scratch_shapes=[pltpu.VMEM((tm, tn), jnp.float32)],
        ),
        compiler_params=pltpu.CompilerParams(
            dimension_semantics=("parallel", "parallel", "arbitrary"),
            vmem_limit_bytes=_VMEM_LIMIT,
        ),
    )(*args)


# ---------------------------------------------------------------------------
# Flash multi-head attention (online softmax, tiled over q and kv)
# ---------------------------------------------------------------------------
def _flash_mha_kernel(q_ref, k_ref, v_ref, o_ref, m_sc, l_sc, acc_sc, *, scale):
    kv_i = pl.program_id(2)

    @pl.when(kv_i == 0)
    def _():
        m_sc[...] = jnp.full(m_sc.shape, -jnp.inf, jnp.float32)
        l_sc[...] = jnp.zeros(l_sc.shape, jnp.float32)
        acc_sc[...] = jnp.zeros(acc_sc.shape, jnp.float32)

    q = q_ref[...]                                         # (tq, dh)
    k = k_ref[...]                                         # (tkv, dh)
    # scores = q @ k^T by contracting the last dims directly (no XLU transpose)
    s = jax.lax.dot_general(
        q, k, (((1,), (1,)), ((), ())),
        preferred_element_type=jnp.float32) * scale        # (tq, tkv)

    m_prev = m_sc[...]
    m_new = jnp.maximum(m_prev, jnp.max(s, axis=-1, keepdims=True))
    alpha = jnp.exp(m_prev - m_new)
    p = jnp.exp(s - m_new)
    l_sc[...] = alpha * l_sc[...] + jnp.sum(p, axis=-1, keepdims=True)
    acc_sc[...] = alpha * acc_sc[...] + jnp.dot(
        p.astype(v_ref.dtype), v_ref[...], preferred_element_type=jnp.float32)
    m_sc[...] = m_new

    @pl.when(kv_i == pl.num_programs(2) - 1)
    def _():
        inv_l = pl.reciprocal(l_sc[...], approx=True)      # EUP vrcp
        o_ref[...] = (acc_sc[...] * inv_l).astype(o_ref.dtype)


def flash_mha(q, k, v, scale):
    """q, k, v: (B*H, S, dh) -> (B*H, S, dh)."""
    BH, S, dh = q.shape
    tq = _pick_tile(S, 256)
    tkv = _pick_tile(S, 256)
    kernel = functools.partial(_flash_mha_kernel, scale=scale)
    return pl.pallas_call(
        kernel,
        out_shape=jax.ShapeDtypeStruct((BH, S, dh), q.dtype),
        grid_spec=pltpu.PrefetchScalarGridSpec(
            num_scalar_prefetch=0,
            grid=(BH, S // tq, S // tkv),
            in_specs=[
                pl.BlockSpec((None, tq, dh), lambda b, i, j: (b, i, 0)),
                pl.BlockSpec((None, tkv, dh), lambda b, i, j: (b, j, 0)),
                pl.BlockSpec((None, tkv, dh), lambda b, i, j: (b, j, 0)),
            ],
            out_specs=pl.BlockSpec((None, tq, dh), lambda b, i, j: (b, i, 0)),
            scratch_shapes=[
                pltpu.VMEM((tq, 1), jnp.float32),   # running max
                pltpu.VMEM((tq, 1), jnp.float32),   # running sum
                pltpu.VMEM((tq, dh), jnp.float32),  # output accumulator
            ],
        ),
        compiler_params=pltpu.CompilerParams(
            dimension_semantics=("parallel", "parallel", "arbitrary"),
            vmem_limit_bytes=_VMEM_LIMIT,
        ),
    )(q, k, v)


# ---------------------------------------------------------------------------
# Encoder forward (wires the kernels together)
# ---------------------------------------------------------------------------
def init_encoder_params(key, dim, depth, heads, dim_head, mlp_dim,
                        dtype=jnp.float32):
    inner = heads * dim_head
    params = []
    for _ in range(depth):
        key, *ks = jax.random.split(key, 14)
        params.append(dict(
            ln1_g=1.0 + 0.1 * jax.random.normal(ks[6], (dim,), dtype),
            ln1_b=0.05 * jax.random.normal(ks[7], (dim,), dtype),
            wq=jax.random.normal(ks[0], (dim, inner), dtype) * (dim ** -0.5),
            wk=jax.random.normal(ks[1], (dim, inner), dtype) * (dim ** -0.5),
            wv=jax.random.normal(ks[2], (dim, inner), dtype) * (dim ** -0.5),
            wo=jax.random.normal(ks[3], (inner, dim), dtype) * (inner ** -0.5),
            bo=0.05 * jax.random.normal(ks[10], (dim,), dtype),
            ln2_g=1.0 + 0.1 * jax.random.normal(ks[8], (dim,), dtype),
            ln2_b=0.05 * jax.random.normal(ks[9], (dim,), dtype),
            w1=jax.random.normal(ks[4], (dim, mlp_dim), dtype) * (dim ** -0.5),
            b1=0.05 * jax.random.normal(ks[11], (mlp_dim,), dtype),
            w2=jax.random.normal(ks[5], (mlp_dim, dim), dtype) * (mlp_dim ** -0.5),
            b2=0.05 * jax.random.normal(ks[12], (dim,), dtype),
        ))
    return params


def encoder_forward(params, x, heads, dim_head):
    B, S, dim = x.shape
    inner = heads * dim_head
    scale = dim_head ** -0.5

    def split_heads(t):
        return (t.reshape(B, S, heads, dim_head)
                 .transpose(0, 2, 1, 3)
                 .reshape(B * heads, S, dim_head))

    for layer in params:
        x2 = x.reshape(B * S, dim)

        # --- ResidualAttn(PreNormAttn(Attention)) ---
        xn = layernorm(x2, layer["ln1_g"], layer["ln1_b"])
        q = linear(xn, layer["wq"])
        k = linear(xn, layer["wk"])
        v = linear(xn, layer["wv"])
        oh = flash_mha(split_heads(q), split_heads(k), split_heads(v), scale)
        o = (oh.reshape(B, heads, S, dim_head)
               .transpose(0, 2, 1, 3)
               .reshape(B * S, inner))
        x2 = linear(o, layer["wo"], bias=layer["bo"], residual=x2)

        # --- Residual(PreNorm(FeedForward)) ---
        xn2 = layernorm(x2, layer["ln2_g"], layer["ln2_b"])
        h = linear(xn2, layer["w1"], bias=layer["b1"], activation="gelu")
        x2 = linear(h, layer["w2"], bias=layer["b2"], residual=x2)

        x = x2.reshape(B, S, dim)
    return x


# ---------------------------------------------------------------------------
# Pure-JAX reference
# ---------------------------------------------------------------------------
def encoder_reference(params, x, heads, dim_head):
    B, S, dim = x.shape
    scale = dim_head ** -0.5

    def ln(t, g, b):
        mu = jnp.mean(t, -1, keepdims=True)
        var = jnp.mean((t - mu) ** 2, -1, keepdims=True)
        return (t - mu) * jax.lax.rsqrt(var + 1e-5) * g + b

    def sh(t):
        return t.reshape(B, S, heads, dim_head).transpose(0, 2, 1, 3)

    for layer in params:
        xn = ln(x, layer["ln1_g"], layer["ln1_b"])
        qh, kh, vh = sh(xn @ layer["wq"]), sh(xn @ layer["wk"]), sh(xn @ layer["wv"])
        dots = jnp.einsum("bhid,bhjd->bhij", qh, kh) * scale
        attn = jax.nn.softmax(dots, axis=-1)
        o = jnp.einsum("bhij,bhjd->bhid", attn, vh)
        o = o.transpose(0, 2, 1, 3).reshape(B, S, heads * dim_head)
        x = o @ layer["wo"] + layer["bo"] + x
        xn2 = ln(x, layer["ln2_g"], layer["ln2_b"])
        h = jax.nn.gelu(xn2 @ layer["w1"] + layer["b1"], approximate=True)
        x = h @ layer["w2"] + layer["b2"] + x
    return x


if __name__ == "__main__":
    B, S = 2, 8
    dim, depth, heads, dim_head, mlp_dim, dropout = 32, 2, 4, 16, 64, 0.0

    key = jax.random.PRNGKey(0)
    kx, kp = jax.random.split(key)
    x = jax.random.normal(kx, (B, S, dim), dtype=jnp.float32)
    params = init_encoder_params(kp, dim, depth, heads, dim_head, mlp_dim)

    out = encoder_forward(params, x, heads, dim_head)
    jax.block_until_ready(out)

    ref = encoder_reference(params, x, heads, dim_head)
    assert out.shape == (B, S, dim)
    max_err = float(jnp.max(jnp.abs(out - ref)))
    assert max_err < 1e-2, f"max abs error {max_err}"

    print("KERNEL_OK")
</pallas_src>

<mosaic_0001>
module attributes {stable_mosaic.version = 11 : i64} {
  func.func @_layernorm_kernel(%arg0: i32, %arg1: memref<16x32xf32, #tpu.memory_space<vmem>>, %arg2: memref<1x32xf32, #tpu.memory_space<vmem>>, %arg3: memref<1x32xf32, #tpu.memory_space<vmem>>, %arg4: memref<16x32xf32, #tpu.memory_space<vmem>>) attributes {dimension_semantics = [#tpu.dimension_semantics<parallel>], iteration_bounds = array<i64: 1>, scalar_prefetch = 0 : i64, scratch_operands = 0 : i64, tpu.core_type = #tpu.core_type<tc>, window_params = [{transform_indices = @transform_0, window_bounds = array<i64: 16, 32>}, {pipeline_mode = #tpu.pipeline_mode<synchronous>, transform_indices = @transform_1, window_bounds = array<i64: 1, 32>}, {pipeline_mode = #tpu.pipeline_mode<synchronous>, transform_indices = @transform_2, window_bounds = array<i64: 1, 32>}, {transform_indices = @transform_3, window_bounds = array<i64: 16, 32>}]} {
    %c0 = arith.constant 0 : index
    %c0_0 = arith.constant 0 : index
    %0 = vector.load %arg1[%c0, %c0_0] : memref<16x32xf32, #tpu.memory_space<vmem>>, vector<16x32xf32>
    %cst = arith.constant dense<0.000000e+00> : vector<16xf32>
    %1 = vector.multi_reduction <add>, %0, %cst [1] : vector<16x32xf32> to vector<16xf32>
    %2 = vector.shape_cast %1 : vector<16xf32> to vector<16x1xf32>
    %cst_1 = arith.constant 3.200000e+01 : f32
    %3 = vector.broadcast %cst_1 : f32 to vector<16x1xf32>
    %4 = arith.divf %2, %3 : vector<16x1xf32>
    %5 = vector.broadcast %4 : vector<16x1xf32> to vector<16x32xf32>
    %6 = arith.subf %0, %5 : vector<16x32xf32>
    %7 = arith.mulf %6, %6 : vector<16x32xf32>
    %cst_2 = arith.constant dense<0.000000e+00> : vector<16xf32>
    %8 = vector.multi_reduction <add>, %7, %cst_2 [1] : vector<16x32xf32> to vector<16xf32>
    %9 = vector.shape_cast %8 : vector<16xf32> to vector<16x1xf32>
    %cst_3 = arith.constant 3.200000e+01 : f32
    %10 = vector.broadcast %cst_3 : f32 to vector<16x1xf32>
    %11 = arith.divf %9, %10 : vector<16x1xf32>
    %cst_4 = arith.constant 9.99999974E-6 : f32
    %12 = vector.broadcast %cst_4 : f32 to vector<16x1xf32>
    %13 = arith.addf %11, %12 : vector<16x1xf32>
    %14 = math.rsqrt %13 : vector<16x1xf32>
    %15 = vector.broadcast %14 : vector<16x1xf32> to vector<16x32xf32>
    %16 = arith.mulf %6, %15 : vector<16x32xf32>
    %c0_5 = arith.constant 0 : index
    %c0_6 = arith.constant 0 : index
    %17 = vector.load %arg2[%c0_5, %c0_6] : memref<1x32xf32, #tpu.memory_space<vmem>>, vector<1x32xf32>
    %18 = vector.broadcast %17 : vector<1x32xf32> to vector<16x32xf32>
    %19 = arith.mulf %16, %18 : vector<16x32xf32>
    %c0_7 = arith.constant 0 : index
    %c0_8 = arith.constant 0 : index
    %20 = vector.load %arg3[%c0_7, %c0_8] : memref<1x32xf32, #tpu.memory_space<vmem>>, vector<1x32xf32>
    %21 = vector.broadcast %20 : vector<1x32xf32> to vector<16x32xf32>
    %22 = arith.addf %19, %21 : vector<16x32xf32>
    %c0_9 = arith.constant 0 : index
    %c0_10 = arith.constant 0 : index
    %23 = vector.load %arg4[%c0_9, %c0_10] : memref<16x32xf32, #tpu.memory_space<vmem>>, vector<16x32xf32>
    tpu.vector_store %arg4[%c0_9, %c0_10], %22 {strides = array<i32>} : memref<16x32xf32, #tpu.memory_space<vmem>>, vector<16x32xf32>,
    return
  }
  func.func @transform_0(%arg0: i32) -> (i32, i32) {
    %c0_i32 = arith.constant 0 : i32
    %c0_i32_0 = arith.constant 0 : i32
    return %arg0, %c0_i32 : i32, i32
  }
  func.func @transform_1(%arg0: i32) -> (i32, i32) {
    %c0_i32 = arith.constant 0 : i32
    %c0_i32_0 = arith.constant 0 : i32
    %c0_i32_1 = arith.constant 0 : i32
    return %c0_i32, %c0_i32_0 : i32, i32
  }
  func.func @transform_2(%arg0: i32) -> (i32, i32) {
    %c0_i32 = arith.constant 0 : i32
    %c0_i32_0 = arith.constant 0 : i32
    %c0_i32_1 = arith.constant 0 : i32
    return %c0_i32, %c0_i32_0 : i32, i32
  }
  func.func @transform_3(%arg0: i32) -> (i32, i32) {
    %c0_i32 = arith.constant 0 : i32
    %c0_i32_0 = arith.constant 0 : i32
    return %arg0, %c0_i32 : i32, i32
  }
}

</mosaic_0001>

<bundles_post_ra>
// kernel: tpu_custom_call.1
= control target key start
LH: loop header
LB: loop body
LE: loop exit
PB: predicated region body
PF: predicated region fallthrough
CT: control target
= control target key end

     0   :  { %8 = vsyncpa [#allocation3], 0  ;;  %s198_s0 = inlined_call_operand.hbm [shape: f32[16,32], index: 0, kind: input, shape index: {}]   ;;  %s199_s1 = inlined_call_operand.vmem [shape: f32[1,32], index: 1, kind: input, shape index: {}]   ;;  %s200_s2 = inlined_call_operand.vmem [shape: f32[1,32], index: 2, kind: input, shape index: {}]   ;;  %s201_s3 = inlined_call_operand.hbm [shape: f32[16,32], index: 3, kind: output, shape index: {}]  }
   0x1   :  { %9 = vsyncpa [#allocation4], 0  ;;  %s150_s12 = smov [#allocation2]  }
   0x2   :  { %s15_s13 = sshll.u32 %s150_s12, 4  ;;  %s16_s13 = int_to_ptr.vmem [resolvable:$true] %s15_s13 }
   0x3   :  { %s114_s14 = scalar_lea.vmem %s16_s13, 256  ;;  %p119_p1 = scmp.lt.s32.totalorder %s16_s13, %s16_s13 }
   0x4   :  { %p115_p0 = scmp.ne.s32.totalorder %s16_s13, %s114_s14  ;;  %p120_p2 = scmp.lt.s32.totalorder %s114_s14, %s114_s14 }
   0x6   :  { %p121_p3 = por %p120_p2, %p119_p1 }
   0x8   :  { %p122_p4 = pnand %p121_p3, %p115_p0 }
   0xa   :  { %125 = shalt.err (!%p122_p4)
}
   0xb   :  { %s151_s15 = smov 128   ;;  %s152_s16 = smov 8  }
   0xc   :  { %21 = dma.hbm_to_vmem [thread:$0]  %s198_s0, 256, %s16_s13, [#allocation3], %s151_s15, %s151_s15, %s152_s16  }
   0xd   :  { %146 = dma.done.wait [#allocation3], 256  }
   0xe   :  { %147 = vsyncadd [#allocation3], 4294967040  ;;  %vm31_vm0 = vcmask 261120   ;;  %v29_v0 = vld [vmem:[#allocation2] sm:$0xff]  ;;  %v30_v1 = vld [vmem:[#allocation2 + $0x8] sm:$0xff]  ;;  %s153_s22 = smov [#allocation5]  }
   0xf   :  { %v32_v2 = vsel %vm31_vm0, %v29_v0, 0.0  ;;  %v35_v3 = vsel %vm31_vm0, %v30_v1, 0.0  ;;  %v96_v21 = vld [vmem:[%s199_s1] ss:$0 sm:$0xff]  ;;  %s84_s23 = sshll.u32 %s153_s22, 4  ;;  %s85_s23 = int_to_ptr.vmem [resolvable:$true] %s84_s23 }
  0x10   :  { %33 = vadd.xlane.f32.xlu0 %v32_v2  ;;  %v97_v23 = vld [vmem:[%s200_s2] ss:$0 sm:$0xff]  ;;  %s126_s24 = scalar_lea.vmem %s85_s23, 256  ;;  %p131_p6 = scmp.lt.s32.totalorder %s85_s23, %s85_s23 }
  0x11   :  { %p127_p5 = scmp.ne.s32.totalorder %s85_s23, %s126_s24  ;;  %p132_p7 = scmp.lt.s32.totalorder %s126_s24, %s126_s24 }
  0x13   :  { %p133_p8 = por %p132_p7, %p131_p6 }
  0x14   :  { %36 = vadd.xlane.f32.xlu0 %v35_v3 }
  0x15   :  { %p134_p9 = pnand %p133_p8, %p127_p5 }
  0x99   :  { %v34_v4 = vpop.xlane.xlu0 %33 }
  0x9a   :  { %v39_v5 = vmul.f32 0.03125, %v34_v4 }
  0x9c   :  { %v41_v6 = vsub.f32 %v29_v0, %v39_v5 }
  0x9d   :  { %v37_v7 = vpop.xlane.xlu0 %36 }
  0x9e   :  { %v40_v8 = vmul.f32 0.03125, %v37_v7  ;;  %v43_v9 = vmul.f32 %v41_v6, %v41_v6 }
  0xa0   :  { %v42_v10 = vsub.f32 %v30_v1, %v40_v8  ;;  %v45_v11 = vsel %vm31_vm0, %v43_v9, 0.0 }
  0xa1   :  { %46 = vadd.xlane.f32.xlu1 %v45_v11 }
  0xa2   :  { %v44_v12 = vmul.f32 %v42_v10, %v42_v10 }
  0xa4   :  { %v48_v13 = vsel %vm31_vm0, %v44_v12, 0.0 }
  0xa5   :  { %49 = vadd.xlane.f32.xlu1 %v48_v13 }
 0x12a   :  { %v47_v14 = vpop.xlane.xlu1 %46 }
 0x12b   :  { %v51_v15 = vmul.f32 0.03125, %v47_v14 }
 0x12d   :  { %v53_v16 = vadd.f32 1e-05, %v51_v15 }
 0x12e   :  { %v50_v17 = vpop.xlane.xlu1 %49 }
 0x12f   :  { %102 = vrsqrt.f32 %v53_v16  ;;  %v52_v18 = vmul.f32 0.03125, %v50_v17 }
 0x131   :  { %v54_v19 = vadd.f32 1e-05, %v52_v18 }
 0x133   :  { %104 = vrsqrt.f32 %v54_v19 }
 0x13c   :  { %v103_v20 = vpop.eup %102 }
 0x13d   :  { %v57_v22 = vmul.f32 %v103_v20, %v41_v6 }
 0x13f   :  { %v66_v24 = vmul.f32 %v96_v21, %v57_v22 }
 0x140   :  { %v105_v25 = vpop.eup %104 }
 0x141   :  { %v58_v26 = vmul.f32 %v105_v25, %v42_v10  ;;  %v75_v27 = vadd.f32 %v97_v23, %v66_v24 }
 0x143   :  { %v67_v28 = vmul.f32 %v96_v21, %v58_v26  ;;  %77 = vst.msk [vmem:[#allocation5] sm:$0xff] %vm31_vm0, %v75_v27 }
 0x145   :  { %v76_v29 = vadd.f32 %v97_v23, %v67_v28 }
 0x147   :  { %78 = vst.msk [vmem:[#allocation5 + $0x8] sm:$0xff] %vm31_vm0, %v76_v29 }
 0x148   :  { %137 = shalt.err (!%p134_p9)
}
 0x149   :  { %90 = dma.vmem_to_hbm [thread:$0]  %s85_s23, 256, %s201_s3, [#allocation4], %s151_s15, %s151_s15, %s152_s16  }
 0x14a   :  { %148 = dma.done.wait [#allocation4], 256  }
 0x14b   :  { %149 = vsyncadd [#allocation4], 4294967040 }
 0x14c   :  { %94 = vsyncpa [#allocation3], 1 }
 0x14d   :  { %95 = vsyncpa [#allocation4], 1 }

</bundles_post_ra>
